<compile_context>
chip_gen: v7x
topology: tpu7x:2x2x1
jax: 0.10.0
libtpu: 0.0.40
codegen_flags: <defaults>
</compile_context>

<pallas_src>
import jax
import jax.numpy as jnp
from jax.experimental import pallas as pl
from jax.experimental.pallas import tpu as pltpu


def conv_bn_relu_kernel(a_ref, w_ref, b_ref, o_ref):
    # a_ref : (tm//g, g*K)      bf16  -- g output positions packed per row (lane-dense)
    # w_ref : (g*K, g*C_out)    bf16  -- block-diagonal replication of the folded (K, C_out) filter
    # b_ref : (1, g*C_out)      f32   -- folded BN bias, tiled g times
    # o_ref : (tm//g, g*C_out)  f32   -- lane-dense (128-lane) output rows
    acc = jnp.dot(a_ref[...], w_ref[...], preferred_element_type=jnp.float32)  # single MXU matmul
    y = acc + b_ref[...]                                   # BN bias (scale already in weights)
    o_ref[...] = jnp.maximum(y, 0.0).astype(o_ref.dtype)   # ReLU


def mixed_op_forward(x_nchw, weight, gamma, beta, running_mean, running_var,
                     stride=1, pad=1, eps=1e-5, tm=512, compute_dtype=jnp.bfloat16):
    """Conv2d(KHxKW, stride, pad, no bias) + BatchNorm2d(eval) + ReLU. NCHW in/out."""
    N, C_in, H, W = x_nchw.shape
    C_out, _, KH, KW = weight.shape
    Ho = (H + 2 * pad - KH) // stride + 1
    Wo = (W + 2 * pad - KW) // stride + 1
    M = N * Ho * Wo
    K = KH * KW * C_in

    # Lane-packing factor: pack g spatial positions per output row so rows are 128 lanes wide.
    g = 128 // C_out if (C_out <= 128 and 128 % C_out == 0) else 1

    # ---- glue: layout only (NCHW -> NHWC, pad, single contiguous im2col matrix) ----
    x = jnp.transpose(x_nchw, (0, 2, 3, 1)).astype(jnp.float32)        # NHWC
    xp = jnp.pad(x, ((0, 0), (pad, pad), (pad, pad), (0, 0)))
    cols = jnp.concatenate(
        [xp[:, dy:dy + Ho * stride:stride, dx:dx + Wo * stride:stride, :]
         for dy in range(KH) for dx in range(KW)],
        axis=-1)                                                       # (N, Ho, Wo, K)
    a = cols.reshape(M, K).astype(compute_dtype)                       # im2col, read once

    # Row tile: multiple of 8*g (sublane unit after packing); keep >= 2 grid steps when possible
    # so v7x's two TensorCores / megacore both get work.
    tm_unit = 8 * g
    tm_req = max(tm_unit, (int(tm) // tm_unit) * tm_unit)
    half_rows = -(-M // 2)                                             # ceil(M / 2)
    two_step_cap = -(-half_rows // tm_unit) * tm_unit                  # round up to tile unit
    tm_eff = max(tm_unit, min(tm_req, two_step_cap))
    Mp = -(-M // tm_eff) * tm_eff
    if Mp != M:
        a = jnp.pad(a, ((0, Mp - M), (0, 0)))                          # only the (M, K) matrix padded
    a = a.reshape(Mp // g, g * K)                                      # free row-major repack

    # ---- fold BN into weights/bias, build block-diagonal packed weight ----
    inv = gamma / jnp.sqrt(running_var + eps)                          # (C_out,)
    w2d = jnp.transpose(weight.astype(jnp.float32), (2, 3, 1, 0)).reshape(K, C_out)
    wf = w2d * inv[None, :]                                            # BN scale folded in
    eye = jnp.eye(g, dtype=jnp.float32)
    w_packed = (eye[:, None, :, None] * wf[None, :, None, :]).reshape(g * K, g * C_out)
    w_packed = w_packed.astype(compute_dtype)
    bias = (beta - running_mean * inv).astype(jnp.float32)
    bias_packed = jnp.tile(bias, (g,)).reshape(1, g * C_out)

    Mg, tmg = Mp // g, tm_eff // g
    grid = (Mg // tmg,)

    out_bytes = Mg * g * C_out * 4
    cost = pl.CostEstimate(
        flops=int(2 * M * K * C_out),
        transcendentals=0,
        bytes_accessed=int(a.size * a.dtype.itemsize
                           + w_packed.size * w_packed.dtype.itemsize
                           + bias_packed.size * 4 + out_bytes))

    # ---- hot path: one fused matmul + bias + ReLU per row tile ----
    out_packed = pl.pallas_call(
        conv_bn_relu_kernel,
        out_shape=jax.ShapeDtypeStruct((Mg, g * C_out), jnp.float32),
        grid_spec=pltpu.PrefetchScalarGridSpec(
            num_scalar_prefetch=0,
            grid=grid,
            in_specs=[
                pl.BlockSpec((tmg, g * K), lambda i: (i, 0)),          # im2col row tile
                pl.BlockSpec((g * K, g * C_out), lambda i: (0, 0)),    # weights (VMEM-resident)
                pl.BlockSpec((1, g * C_out), lambda i: (0, 0)),        # bias   (VMEM-resident)
            ],
            out_specs=pl.BlockSpec((tmg, g * C_out), lambda i: (i, 0)),
        ),
        compiler_params=pltpu.CompilerParams(
            dimension_semantics=("parallel",),
            vmem_limit_bytes=32 * 1024 * 1024),                        # ample; working set ~0.5 MB
        cost_estimate=cost,
    )(a, w_packed, bias_packed)

    # Padded rows (if any) hold ReLU(bias) garbage; sliced off here.
    out = out_packed.reshape(Mp, C_out)[:M].reshape(N, Ho, Wo, C_out)
    return jnp.transpose(out, (0, 3, 1, 2))                            # back to NCHW


def _reference(x_nchw, weight, gamma, beta, running_mean, running_var,
               stride=1, pad=1, eps=1e-5):
    y = jax.lax.conv_general_dilated(
        x_nchw.astype(jnp.float32), weight.astype(jnp.float32),
        window_strides=(stride, stride), padding=[(pad, pad), (pad, pad)],
        dimension_numbers=("NCHW", "OIHW", "NCHW"))
    s = gamma / jnp.sqrt(running_var + eps)
    b = beta - running_mean * s
    y = y * s[None, :, None, None] + b[None, :, None, None]
    return jnp.maximum(y, 0.0)


if __name__ == "__main__":
    # MixedOp(op_idx=0, C_in=4, C_out=8, kernel_size=3, stride=1, pad=1)
    N, C_in, C_out, H, W = 2, 4, 8, 16, 16
    KH = KW = 3

    key = jax.random.PRNGKey(0)
    kx, kw, km, kv = jax.random.split(key, 4)
    x = jax.random.normal(kx, (N, C_in, H, W), dtype=jnp.float32)
    weight = 0.1 * jax.random.normal(kw, (C_out, C_in, KH, KW), dtype=jnp.float32)
    gamma = jnp.ones((C_out,), jnp.float32)
    beta = jnp.zeros((C_out,), jnp.float32)
    running_mean = 0.05 * jax.random.normal(km, (C_out,), dtype=jnp.float32)
    running_var = 1.0 + 0.1 * jnp.abs(jax.random.normal(kv, (C_out,), dtype=jnp.float32))

    out = mixed_op_forward(x, weight, gamma, beta, running_mean, running_var,
                           stride=1, pad=1)
    out = jax.block_until_ready(out)

    ref = _reference(x, weight, gamma, beta, running_mean, running_var)
    assert out.shape == (N, C_out, H, W), out.shape
    # bf16 operands / f32 accumulation: tolerance set accordingly.
    assert jnp.allclose(out, ref, rtol=3e-2, atol=3e-2), float(jnp.max(jnp.abs(out - ref)))

    print("KERNEL_OK")
</pallas_src>

<mosaic_0001>
module attributes {stable_mosaic.version = 11 : i64} {
  func.func @conv_bn_relu_kernel(%arg0: i32, %arg1: memref<16x576xbf16, #tpu.memory_space<vmem>>, %arg2: memref<576x128xbf16, #tpu.memory_space<vmem>>, %arg3: memref<1x128xf32, #tpu.memory_space<vmem>>, %arg4: memref<16x128xf32, #tpu.memory_space<vmem>>) attributes {dimension_semantics = [#tpu.dimension_semantics<parallel>], iteration_bounds = array<i64: 2>, scalar_prefetch = 0 : i64, scratch_operands = 0 : i64, tpu.core_type = #tpu.core_type<tc>, window_params = [{transform_indices = @transform_0, window_bounds = array<i64: 16, 576>}, {pipeline_mode = #tpu.pipeline_mode<synchronous>, transform_indices = @transform_1, window_bounds = array<i64: 576, 128>}, {pipeline_mode = #tpu.pipeline_mode<synchronous>, transform_indices = @transform_2, window_bounds = array<i64: 1, 128>}, {transform_indices = @transform_3, window_bounds = array<i64: 16, 128>}]} {
    %c0 = arith.constant 0 : index
    %c0_0 = arith.constant 0 : index
    %0 = vector.load %arg1[%c0, %c0_0] : memref<16x576xbf16, #tpu.memory_space<vmem>>, vector<16x576xbf16>
    %c0_1 = arith.constant 0 : index
    %c0_2 = arith.constant 0 : index
    %1 = vector.load %arg2[%c0_1, %c0_2] : memref<576x128xbf16, #tpu.memory_space<vmem>>, vector<576x128xbf16>
    %cst = arith.constant dense<0.000000e+00> : vector<16x128xf32>
    %2 = tpu.matmul %0, %1, %cst {dimension_numbers = #tpu.dot_dimension_numbers<[1], [0], [0], [1], [0, 0, 1, 1], [], []>} : vector<16x576xbf16>, vector<576x128xbf16>, vector<16x128xf32> -> vector<16x128xf32>
    %c0_3 = arith.constant 0 : index
    %c0_4 = arith.constant 0 : index
    %3 = vector.load %arg3[%c0_3, %c0_4] : memref<1x128xf32, #tpu.memory_space<vmem>>, vector<1x128xf32>
    %4 = vector.broadcast %3 : vector<1x128xf32> to vector<16x128xf32>
    %5 = arith.addf %2, %4 : vector<16x128xf32>
    %cst_5 = arith.constant 0.000000e+00 : f32
    %6 = vector.broadcast %cst_5 : f32 to vector<16x128xf32>
    %7 = arith.maximumf %5, %6 : vector<16x128xf32>
    %c0_6 = arith.constant 0 : index
    %c0_7 = arith.constant 0 : index
    %8 = vector.load %arg4[%c0_6, %c0_7] : memref<16x128xf32, #tpu.memory_space<vmem>>, vector<16x128xf32>
    tpu.vector_store %arg4[%c0_6, %c0_7], %7 {strides = array<i32>} : memref<16x128xf32, #tpu.memory_space<vmem>>, vector<16x128xf32>,
    return
  }
  func.func @transform_0(%arg0: i32) -> (i32, i32) {
    %c0_i32 = arith.constant 0 : i32
    %c0_i32_0 = arith.constant 0 : i32
    return %arg0, %c0_i32 : i32, i32
  }
  func.func @transform_1(%arg0: i32) -> (i32, i32) {
    %c0_i32 = arith.constant 0 : i32
    %c0_i32_0 = arith.constant 0 : i32
    %c0_i32_1 = arith.constant 0 : i32
    return %c0_i32, %c0_i32_0 : i32, i32
  }
  func.func @transform_2(%arg0: i32) -> (i32, i32) {
    %c0_i32 = arith.constant 0 : i32
    %c0_i32_0 = arith.constant 0 : i32
    %c0_i32_1 = arith.constant 0 : i32
    return %c0_i32, %c0_i32_0 : i32, i32
  }
  func.func @transform_3(%arg0: i32) -> (i32, i32) {
    %c0_i32 = arith.constant 0 : i32
    %c0_i32_0 = arith.constant 0 : i32
    return %arg0, %c0_i32 : i32, i32
  }
}

</mosaic_0001>

<bundles_post_ra>
// kernel: tpu_custom_call.1
= control target key start
LH: loop header
LB: loop body
LE: loop exit
PB: predicated region body
PF: predicated region fallthrough
CT: control target
= control target key end

     0   :  { %8 = vsyncpa [#allocation3], 0  ;;  %s1366_s0 = inlined_call_operand.hbm [shape: bf16[32,576], index: 0, kind: input, shape index: {}]   ;;  %s1367_s1 = inlined_call_operand.hbm [shape: bf16[576,128], index: 1, kind: input, shape index: {}]   ;;  %s1368_s2 = inlined_call_operand.vmem [shape: f32[1,128], index: 2, kind: input, shape index: {}]   ;;  %s1369_s3 = inlined_call_operand.hbm [shape: f32[32,128], index: 3, kind: output, shape index: {}]  }
   0x1   :  { %10 = vsyncpa [#allocation3 + $0x1], 0 }
   0x2   :  { %11 = vsyncpa [#allocation6], 0 }
   0x3   :  { %12 = vsyncpa [#allocation4], 0 }
   0x4   :  { %14 = vsyncpa [#allocation4 + $0x1], 0  ;;  %s1154_s12 = smov 0   ;;  %s1156_s13 = smov 0  }
   0x5   :  { %s1158_s14 = smov 0   ;;  %s1160_s15 = smov 0  }
   0x6 LB: > { %s1175_s16 = sadd.s32 4294967295, %s1121_s15   ;;  %s762_s17 = sadd.s32 4294967294, %s1121_s15   ;;  %s1121_s15 = sphi %s1160_s15, %s1389_s15   ;;  %s1117_s14 = sphi %s1158_s14, %s1388_s14   ;;  %s1113_s13 = sphi %s1156_s13, %s1387_s13   ;;  %s1109_s12 = sphi %s1154_s12, %s1386_s12  }
   0x7   : > { %p40_p0 = scmp.ne.s32.totalorder %s1113_s13, %s1109_s12  ;;  %p1370_p1 = scmp.eq.s32.totalorder %s1175_s16, 0 }
   0x8   : > { %p112_p3 = scmp.eq.s32.totalorder %s762_s17, 1  ;;  %p763_p5 = scmp.ge.s32.totalorder %s1121_s15, 1 }
   0x9   : > { %p1184_p4 = por %p1370_p1, %p40_p0  ;;  %p119_p7 = scmp.lt.s32.totalorder %s1121_s15, 3 }
   0xa   : > { %p1189_p6 = por %p112_p3, %p40_p0  ;;  %s1123_s21 = smov [#allocation5]  }
   0xb   : > { %s1373_s18 = scalar_select %p1184_p4, 1, 0 }
   0xc   : > { %s1374_s19 = scalar_select %p1189_p6, 1, 0 }
   0xd   : > { %p1194_p8 = pnand %p763_p5, %p119_p7  ;;  %s131_s22 = sshll.u32 %s1123_s21, 4  ;;  %s1198_s22 = int_to_ptr.vmem [resolvable:$true] %s131_s22 }
   0xe   : > { %s1210_s24 = sadd.s32 1, %s1121_s15   ;;  %s27_s25 = sadd.s32 1, %s1117_s14 }
   0xf   : > { %s1375_s20 = scalar_select %p1194_p8, 1, 0 }
  0x10   : > { %p893_p9 = pneg %p1194_p8  ;;  %s24_s26 = ssub.s32 %s1121_s15, %s1210_s24 }
  0x11   : > { %s993_s29 = scalar_lea.hbm %s1367_s1, 4608 }
  0x12   : > { %p1205_p11 = pnand %p893_p9, %p1370_p1  ;;  %p994_p12 = scmp.ne.s32.totalorder %s1367_s1, %s993_s29 }
  0x13   : > { %p1000_p5 = scmp.lt.u32.totalorder %s993_s29, %s1367_s1 }
  0x14   : > { %p995_p13 = pneg %p1205_p11 }
  0x16   : > { %p996_p0 = pnand %p995_p13, %p994_p12 }
  0x18   : > { %p997_p3 = pneg %p996_p0 }
  0x1a   : > { %p1002_p7 = pnand %p1000_p5, %p997_p3 }
  0x1c   : > { %1005 = shalt.err (!%p1002_p7)
}
  0x1d   : > { %s1006_s7 = scalar_lea.vmem %s1198_s22, 4608  ;;  %p1014_p2 = scmp.lt.s32.totalorder %s1198_s22, %s1198_s22 }
  0x1e   : > { %p1007_p9 = scmp.ne.s32.totalorder %s1198_s22, %s1006_s7  ;;  %p1015_p6 = scmp.lt.s32.totalorder %s1006_s7, %s1006_s7 }
  0x20   : > { %p1009_p10 = pnand %p1007_p9, %p995_p13  ;;  %p1016_p4 = por %p1015_p6, %p1014_p2 }
  0x22   : > { %p1010_p1 = pneg %p1009_p10 }
  0x24   : > { %p1017_p8 = pnand %p1016_p4, %p1010_p1 }
  0x26   : > { %1020 = shalt.err (!%p1017_p8)
}
  0x27   : > { %s1124_s8 = smov 64   ;;  %s1125_s9 = smov 4  }
  0x28   : > { %896 = dma.hbm_to_vmem [thread:$0]  (!%p1205_p11), %s1367_s1, 4608, %s1198_s22, [#allocation6], %s1124_s8, %s1124_s8, %s1125_s9  }
  0x29   : > { %p25_p2 = scmp.eq.s32.totalorder %s24_s26, 0  ;;  %p34_p1 = scmp.ne.s32.totalorder %s1117_s14, %s1113_s13 }
  0x2a   : > { %p35_p4 = scmp.eq.s32.totalorder %s1121_s15, 0  ;;  %p906_p6 = scmp.lt.s32.totalorder %s1121_s15, 2 }
  0x2b   : > { %s1241_s17 = scalar_select %p25_p2, %s1117_s14, %s27_s25  }
  0x2c   : > { %p36_p8 = por %p35_p4, %p34_p1  ;;  %p1377_p10 = scmp.eq.s32.totalorder %s1175_s16, 1 }
  0x2d   : > { %s148_s27 = sand.u32 1, %s1117_s14   ;;  %s883_s28 = smul.u32 640, %s1121_s15 }
  0x2e   : > { %p1245_p12 = por %p1377_p10, %p34_p1  ;;  %s882_s29 = smul.u32 40, %s148_s27 }
  0x2f   : > { %s1254_s4 = scalar_lea.hbm %s1366_s0, %s883_s28  ;;  %p1256_p11 = pnand %p906_p6, %p36_p8 }
  0x30   : > { %s152_s25 = scalar_lea.vmem [#allocation2], %s882_s29  ;;  %s1262_s5 = scalar_lea.sflag [#allocation3], %s148_s27 }
  0x31   : > { %s160_s26 = sshll.u32 %s152_s25, 4  ;;  %s1021_s6 = scalar_lea.hbm %s1254_s4, 640  ;;  %s1260_s26 = int_to_ptr.vmem [resolvable:$true] %s160_s26 }
  0x32   : > { %p1022_p13 = scmp.ne.s32.totalorder %s1254_s4, %s1021_s6  ;;  %p1023_p0 = pneg %p1256_p11 }
  0x33   : > { %s1026_s9 = scalar_lea.hbm %s1366_s0, 1280  ;;  %p1027_p7 = scmp.lt.u32.totalorder %s1254_s4, %s1366_s0 }
  0x34   : > { %p1024_p3 = pnand %p1023_p0, %p1022_p13  ;;  %p1028_p9 = scmp.lt.u32.totalorder %s1026_s9, %s1021_s6 }
  0x35   : > { %p1030_p1 = scmp.lt.u32.totalorder %s1021_s6, %s1254_s4 }
  0x36   : > { %p1025_p5 = pneg %p1024_p3  ;;  %p1029_p2 = por %p1028_p9, %p1027_p7 }
  0x38   : > { %p1031_p4 = por %p1030_p1, %p1029_p2 }
  0x3a   : > { %p1032_p6 = pnand %p1031_p4, %p1025_p5 }
  0x3c   : > { %1035 = shalt.err (!%p1032_p6)
}
  0x3d   : > { %s1036_s27 = scalar_lea.vmem %s1260_s26, 640  ;;  %s1126_s28 = smov [#allocation2]  }
  0x3e   : > { %p1037_p8 = scmp.ne.s32.totalorder %s1260_s26, %s1036_s27  ;;  %s1041_s29 = sshll.u32 %s1126_s28, 4  ;;  %s1042_s29 = int_to_ptr.vmem [resolvable:$false] %s1041_s29 }
  0x3f   : > { %s1043_s23 = scalar_lea.vmem %s1042_s29, 1280  ;;  %p1044_p3 = scmp.lt.s32.totalorder %s1260_s26, %s1042_s29 }
  0x40   : > { %p1039_p10 = pnand %p1037_p8, %p1023_p0  ;;  %p1045_p7 = scmp.lt.s32.totalorder %s1043_s23, %s1036_s27 }
  0x42   : > { %p1040_p13 = pneg %p1039_p10  ;;  %p1046_p9 = por %p1045_p7, %p1044_p3 }
  0x44   : > { %p1047_p2 = pnand %p1046_p9, %p1040_p13 }
  0x46   : > { %1050 = shalt.err (!%p1047_p2)
}
  0x47   : > { %s1127_s30 = smov 320   ;;  %s1128_s25 = smov 20  }
  0x48   : > { %900 = dma.hbm_to_vmem [thread:$0]  (!%p1256_p11), %s1254_s4, 640, %s1260_s26, %s1262_s5, %s1127_s30, %s1127_s30, %s1128_s25  }
  0x49   : > { %p1380_p0 = scmp.ne.s32.totalorder %s1375_s20, 0 }
  0x4a   : > { %s1293_s6 = sand.u32 (!%p1380_p0), 1, %s1113_s13   ;;  %p1381_p5 = scmp.ne.s32.totalorder (!%p1380_p0), %s1373_s18, 0 }
  0x4b   : > { %172 = sbr.rel (%p1380_p0) target bundleno = 368 (0x170), region = 32  ;;  %s175_s8 = scalar_lea.sflag (!%p1380_p0), [#allocation3], %s1293_s6 }
  0x4c   : > { %s884_s7 = smul.u32 (!%p1380_p0), 40, %s1293_s6 }
  0x4e   : > { %s1297_s9 = scalar_lea.vmem (!%p1380_p0), [#allocation2], %s884_s7 }
  0x52   : > { %1096 = dma.done.wait (%p1381_p5), %s175_s8, 640  }
  0x53   : > { %1098 = vsyncadd (%p1381_p5), %s175_s8, 4294966656  ;;  %p1382_p11 = scmp.eq.s32.totalorder %s1175_s16, 0 }
  0x55   : > { %1100 = dma.done.wait (%p1382_p11), [#allocation6], 4608   ;;  %p1383_p1 = pmov %p1382_p11 }
  0x56   : > { %v950_v0 = vld [vmem:[#allocation5 + $0x40] sm:$0xff]   ;;  %v954_v4 = vld [vmem:[#allocation5 + $0x48] sm:$0xff]   ;;  %v958_v8 = vld [vmem:[#allocation5 + $0x50] sm:$0xff]   ;;  %v1129_v33 = vmov 0.0   ;;  %vm1130_vm0 = vmmov 0   ;;  %vm534_vm1 = vcmask 523264  }
  0x57   : > { %1102 = vsyncadd (%p1383_p1), [#allocation6], 4294962688  ;;  %v951_v1 = vld [vmem:[#allocation5] sm:$0xff]   ;;  %821 = vmatprep.subr.bf16.mxu0 %v950_v0  ;;  %v955_v5 = vld [vmem:[#allocation5 + $0x8] sm:$0xff]   ;;  %s771_s4 = sshll.u32 %s1293_s6, 4  ;;  %s820_s5 = sshll.u32 %s1175_s16, 8 }
  0x58   : > { %v952_v2 = vld [vmem:[#allocation5 + $0xc0] sm:$0xff]   ;;  %822 = vmatpush3.bf16.msra.mxu0 %v951_v1  ;;  %v956_v6 = vld [vmem:[#allocation5 + $0xc8] sm:$0xff]   ;;  %v959_v9 = vld [vmem:[#allocation5 + $0x10] sm:$0xff]   ;;  %s204_s22 = scalar_lea.vmem [#allocation7], %s771_s4  ;;  %s1322_s27 = scalar_lea.hbm %s1369_s3, %s820_s5 }
  0x59   : > { %v953_v3 = vld [vmem:[#allocation5 + $0x80] sm:$0xff]   ;;  %843 = vmatprep.subr.bf16.mxu1 %v952_v2  ;;  %823 = vmatprep.subr.bf16.mxu0 %v954_v4  ;;  %v957_v7 = vld [vmem:[#allocation5 + $0x88] sm:$0xff]   ;;  %v960_v10 = vld [vmem:[#allocation5 + $0xd0] sm:$0xff]   ;;  %s679_s26 = sshll.u32 %s204_s22, 4  ;;  %s666_s28 = scalar_lea.sflag [#allocation4], %s1293_s6  ;;  %s1317_s26 = int_to_ptr.vmem [resolvable:$true] %s679_s26 }
  0x5a   : > { %844 = vmatpush3.bf16.msra.mxu1 %v953_v3  ;;  %v961_v11 = vld [vmem:[#allocation5 + $0x90] sm:$0xff]   ;;  %v962_v12 = vld [vmem:[#allocation5 + $0x58] sm:$0xff]   ;;  %v966_v16 = vld [vmem:[#allocation5 + $0x60] sm:$0xff]   ;;  %s1051_s29 = scalar_lea.vmem %s1317_s26, 256  ;;  %s1131_s16 = smov [#allocation7]  }
  0x5b   : > { %845 = vmatprep.subr.bf16.mxu1 %v956_v6  ;;  %v963_v13 = vld [vmem:[#allocation5 + $0x18] sm:$0xff]   ;;  %v967_v17 = vld [vmem:[#allocation5 + $0x20] sm:$0xff]   ;;  %v970_v20 = vld [vmem:[#allocation5 + $0x68] sm:$0xff]   ;;  %p1052_p4 = scmp.ne.s32.totalorder %s1317_s26, %s1051_s29  ;;  %s1055_s23 = sshll.u32 %s1131_s16, 4  ;;  %s1056_s23 = int_to_ptr.vmem [resolvable:$false] %s1055_s23 }
  0x5c   : > { %824 = vmatpush3.bf16.msra.mxu0 %v955_v5  ;;  %v964_v14 = vld [vmem:[#allocation5 + $0xd8] sm:$0xff]   ;;  %v968_v18 = vld [vmem:[#allocation5 + $0xe0] sm:$0xff]   ;;  %v971_v21 = vld [vmem:[#allocation5 + $0x28] sm:$0xff]   ;;  %s1057_s30 = scalar_lea.vmem %s1056_s23, 512  ;;  %p1058_p10 = scmp.lt.s32.totalorder %s1317_s26, %s1056_s23 }
  0x5d   : > { %825 = vmatprep.subr.bf16.mxu0 %v958_v8  ;;  %v965_v15 = vld [vmem:[#allocation5 + $0x98] sm:$0xff]   ;;  %v969_v19 = vld [vmem:[#allocation5 + $0xa0] sm:$0xff]   ;;  %v972_v22 = vld [vmem:[#allocation5 + $0xe8] sm:$0xff]   ;;  %p1053_p6 = pnand %p1052_p4, %p1245_p12  ;;  %p1059_p13 = scmp.lt.s32.totalorder %s1057_s30, %s1051_s29 }
  0x5e   : > { %846 = vmatpush3.bf16.msra.mxu1 %v957_v7  ;;  %v973_v23 = vld [vmem:[#allocation5 + $0xa8] sm:$0xff]   ;;  %v974_v24 = vld [vmem:[#allocation5 + $0x70] sm:$0xff]   ;;  %v978_v28 = vld [vmem:[#allocation5 + $0x78] sm:$0xff]  }
  0x5f   : > { %847 = vmatprep.subr.bf16.mxu1 %v960_v10  ;;  %v975_v25 = vld [vmem:[#allocation5 + $0x30] sm:$0xff]   ;;  %v979_v29 = vld [vmem:[#allocation5 + $0x38] sm:$0xff]   ;;  %v988_v37 = vld [vmem:[#allocation5 + $0x100] sm:$0xff]   ;;  %p1054_p8 = pneg %p1053_p6  ;;  %p1060_p3 = por %p1059_p13, %p1058_p10 }
  0x60   : > { %826 = vmatpush3.bf16.msra.mxu0 %v959_v9  ;;  %v976_v26 = vld [vmem:[#allocation5 + $0xf0] sm:$0xff]   ;;  %v980_v30 = vld [vmem:[#allocation5 + $0xf8] sm:$0xff]   ;;  %v989_v38 = vld [vmem:[#allocation5 + $0x108] sm:$0xff]  }
  0x61   : > { %827 = vmatprep.subr.bf16.mxu0 %v962_v12  ;;  %v977_v27 = vld [vmem:[#allocation5 + $0xb0] sm:$0xff]   ;;  %v984_v34 = vld [vmem:[#allocation5 + $0xb8] sm:$0xff]   ;;  %p1061_p7 = pnand %p1060_p3, %p1054_p8 }
  0x62   : > { %848 = vmatpush3.bf16.msra.mxu1 %v961_v11  ;;  %v981_v31 = vld [vmem:[%s1297_s9] ss:$20 sps:$4 sm:$0xff]   ;;  %v983_v32 = vld [vmem:[%s1297_s9 + $0x4] ss:$20 sps:$4 sm:$0xff]   ;;  %v985_v35 = vld [vmem:[%s1297_s9 + $0x8] ss:$20 sps:$4 sm:$0xff]  }
  0x63   : > { %849 = vmatprep.subr.bf16.mxu1 %v964_v14  ;;  %570 = vmatprep.mubr.bf16.mxu0 %v983_v32  ;;  %v987_v36 = vld [vmem:[%s1297_s9 + $0xc] ss:$20 sps:$4 sm:$0xff]   ;;  %v992_v41 = vld [vmem:[%s1297_s9 + $0x10] ss:$20 sps:$4 sm:$0xff]  }
  0x64   : > { %828 = vmatpush3.bf16.msra.mxu0 %v963_v13  ;;  %611 = vmatprep.mubr.bf16.mxu1 %v987_v36  ;;  %v990_v39 = vld [vmem:[#allocation5 + $0x110] sm:$0xff]   ;;  %v991_v40 = vld [vmem:[#allocation5 + $0x118] sm:$0xff]  }
  0x65   : > { %829 = vmatprep.subr.bf16.mxu0 %v966_v16  ;;  %v772_v43 = vld [vmem:[%s1368_s2] ss:$0 sm:$0xff] }
  0x66   : > { %850 = vmatpush3.bf16.msra.mxu1 %v965_v15 }
  0x67   : > { %851 = vmatprep.subr.bf16.mxu1 %v968_v18 }
  0x68   : > { %830 = vmatpush3.bf16.msra.mxu0 %v967_v17 }
  0x69   : > { %831 = vmatprep.subr.bf16.mxu0 %v970_v20 }
  0x6a   : > { %852 = vmatpush3.bf16.msra.mxu1 %v969_v19 }
  0x6b   : > { %853 = vmatprep.subr.bf16.mxu1 %v972_v22 }
  0x6c   : > { %832 = vmatpush3.bf16.msra.mxu0 %v971_v21 }
  0x6d   : > { %833 = vmatprep.subr.bf16.mxu0 %v974_v24 }
  0x6e   : > { %854 = vmatpush3.bf16.msra.mxu1 %v973_v23 }
  0x6f   : > { %855 = vmatprep.subr.bf16.mxu1 %v976_v26 }
  0x70   : > { %834 = vmatpush3.bf16.msra.mxu0 %v975_v25 }
  0x71   : > { %835 = vmatprep.subr.bf16.mxu0 %v978_v28 }
  0x72   : > { %856 = vmatpush3.bf16.msra.mxu1 %v977_v27 }
  0x73   : > { %857 = vmatprep.subr.bf16.mxu1 %v980_v30 }
  0x74   : > { %836 = vmatpush3.bf16.msra.mxu0 %v979_v29 }
  0x75   : > { %870 = vmatprep.subr.bf16.mxu0 %v1129_v33 }
  0x76   : > { %858 = vmatpush3.bf16.msra.mxu1 %v984_v34 }
  0x77   : > { %571 = vmatmul.mubr.bf16.vlgmr.msra.gmra.mrb[0].mxu0 %v981_v31 }
  0x78   : > { %878 = vmatprep.mubr.msk.bf16.mxu0 %vm1130_vm0, %v1129_v33  ;;  %871 = vmatpush3.bf16.msra.mxu0 %v988_v37 }
  0x79   : > { %612 = vmatmul.mubr.bf16.vlgmr.msra.gmra.mrb[0].mxu1 %v985_v35  ;;  %872 = vmatprep.subr.bf16.mxu0 %v1129_v33 }
  0x7c   : > { %873 = vmatpush3.bf16.msra.mxu0 %v989_v38 }
  0x7d   : > { %874 = vmatprep.subr.bf16.mxu0 %v1129_v33 }
  0x80   : > { %875 = vmatpush3.bf16.msra.mxu0 %v990_v39 }
  0x81   : > { %876 = vmatprep.subr.bf16.mxu0 %v1129_v33 }
  0x84   : > { %877 = vmatpush3.bf16.msra.mxu0 %v991_v40 }
  0x87   : > { %879 = vmatmul.mubr.msk.bf16.vlgmr.msra.gmra.mrb[4].mxu0 %vm534_vm1, %v992_v41 }
 0x14a   : > { %v837_v42 = vpop.f32.mrb[0].mxu0 }
 0x14b   : > { %v838_v44 = vpop.f32.mrb[1].mxu0 }
 0x14c   : > { %v839_v45 = vadd.f32 %v838_v44, %v837_v42  ;;  %v840_v46 = vpop.f32.mrb[2].mxu0  ;;  %v859_v47 = vpop.f32.mrb[0].mxu1 }
 0x14d   : > { %v841_v48 = vpop.f32.mrb[3].mxu0  ;;  %v860_v51 = vpop.f32.mrb[1].mxu1 }
 0x14e   : > { %v573_v49 = vadd.f32 %v839_v45, %v772_v43  ;;  %v842_v50 = vadd.f32 %v841_v48, %v840_v46  ;;  %v861_v52 = vadd.f32 %v860_v51, %v859_v47  ;;  %v862_v53 = vpop.f32.mrb[2].mxu1 }
 0x14f   : > { %v863_v55 = vpop.f32.mrb[3].mxu1 }
 0x150   : > { %v576_v54 = vadd.f32 %v842_v50, %v772_v43  ;;  %v864_v56 = vadd.f32 %v863_v55, %v862_v53  ;;  %v614_v57 = vadd.f32 %v861_v52, %v573_v49 }
 0x152   : > { %v617_v58 = vadd.f32 %v864_v56, %v576_v54 }
 0x15a   : > { %v654_v59 = vpop.f32.mrb[4].mxu0 }
 0x15b   : > { %v655_v60 = vadd.f32 %v654_v59, %v614_v57  ;;  %v880_v61 = vpop.f32.mrb[5].mxu0 }
 0x15c   : > { %v657_v62 = vpop.f32.mrb[6].mxu0 }
 0x15d   : > { %v661_v63 = vmax.f32 %v655_v60, 0.0  ;;  %v658_v0 = vadd.f32 %v657_v62, %v617_v58  ;;  %v881_v1 = vpop.f32.mrb[7].mxu0 }
 0x15f   : > { %663 = vst [vmem:[%s204_s22] sm:$0xff] %v661_v63  ;;  %v662_v2 = vmax.f32 %v658_v0, 0.0 }
 0x161   : > { %664 = vst [vmem:[%s204_s22 + $0x8] sm:$0xff] %v662_v2 }
 0x162   : > { %1064 = shalt.err (!%p1061_p7)
}
 0x163   : > { %s1065_s25 = scalar_lea.hbm %s1322_s27, 256  ;;  %s1069_s9 = scalar_lea.hbm %s1369_s3, 512 }
 0x164   : > { %p1066_p9 = scmp.ne.s32.totalorder %s1322_s27, %s1065_s25  ;;  %p1070_p5 = scmp.lt.u32.totalorder %s1322_s27, %s1369_s3 }
 0x165   : > { %p1071_p11 = scmp.lt.u32.totalorder %s1069_s9, %s1065_s25  ;;  %p1073_p4 = scmp.lt.u32.totalorder %s1065_s25, %s1322_s27 }
 0x166   : > { %p1067_p2 = pnand %p1066_p9, %p1245_p12 }
 0x167   : > { %p1072_p1 = por %p1071_p11, %p1070_p5 }
 0x168   : > { %p1068_p0 = pneg %p1067_p2 }
 0x169   : > { %p1074_p6 = por %p1073_p4, %p1072_p1 }
 0x16b   : > { %p1075_p8 = pnand %p1074_p6, %p1068_p0 }
 0x16d   : > { %1078 = shalt.err (!%p1075_p8)
}
 0x16e   : > { %s1132_s4 = smov 128   ;;  %s1133_s22 = smov 8  }
 0x16f   : > { %891 = dma.vmem_to_hbm [thread:$0]  (%p1245_p12), %s1317_s26, 256, %s1322_s27, %s666_s28, %s1132_s4, %s1132_s4, %s1133_s22  }
 0x170 PF: > { %s694_s5 = sand.u32 1, %s1109_s12   ;;  %p1384_p10 = scmp.ne.s32.totalorder %s1374_s19, 0 }
 0x171   : > { %p1385_p13 = scmp.ge.s32.totalorder %s1121_s15, 2  ;;  %s695_s10 = scalar_lea.sflag [#allocation4], %s694_s5 }
 0x173   : > { %p902_p3 = pnand %p1385_p13, %p1384_p10 }
 0x175   : > { %1104 = dma.done.wait (!%p902_p3), %s695_s10, 256  }
 0x176   : > { %1106 = vsyncadd (!%p902_p3), %s695_s10, 4294967040  ;;  %p17_p7 = scmp.ge.s32.totalorder %s1210_s24, 4   ;;  %s1386_s12 = smov %s1113_s13 }
 0x177   : > { %s1387_s13 = smov %s1117_s14  ;;  %s1388_s14 = smov %s1241_s17 }
 0x178   : > { %s1389_s15 = smov %s1210_s24  ;;  %19 = sbr.rel (!%p17_p7) target bundleno = 6 (0x6), region = 81 }
 0x17f   :  { %700 = vsyncpa [#allocation3], 1 }
 0x180   :  { %702 = vsyncpa [#allocation3 + $0x1], 1 }
 0x181   :  { %703 = vsyncpa [#allocation6], 1 }
 0x182   :  { %704 = vsyncpa [#allocation4], 1 }
 0x183   :  { %706 = vsyncpa [#allocation4 + $0x1], 1 }

</bundles_post_ra>
